<compile_context>
chip_gen: v6e
topology: v6e:2x2x1
jax: 0.10.0
libtpu: 0.0.40
codegen_flags: <defaults>
</compile_context>

<pallas_src>
import math

import jax
import jax.numpy as jnp
from jax.experimental import pallas as pl
from jax.experimental.pallas import tpu as pltpu

# ----------------------------- config ---------------------------------------
B = 2            # batch
S = 8            # sequence length
H = 32           # hidden size
NH = 4           # num attention heads
HD = H // NH     # head dim
F = 128          # feed-forward intermediate size (4 * H)
EPS = 1e-5       # nn.LayerNorm default eps


def _layer_norm(v, gamma, beta):
    mu = jnp.mean(v, axis=-1, keepdims=True)
    var = jnp.mean((v - mu) ** 2, axis=-1, keepdims=True)
    return (v - mu) * jax.lax.rsqrt(var + EPS) * gamma + beta


# ----------------------------- kernel ---------------------------------------
def encoder_block_kernel(
    x_ref,        # (B*S, H)   flattened hidden states
    mask_ref,     # (B, 1, S)  attention mask (1 attend / 0 masked)
    wqkv_ref,     # (H, 3H)    fused Wq|Wk|Wv
    bqkv_ref,     # (1, 3H)    fused bq|bk|bv
    wo_ref,       # (NH, HD, H) per-head output projection
    w1_ref,       # (H, F)
    b1_ref,       # (1, F)
    w2_ref,       # (F, H)
    vecs_ref,     # (6, H)     [bo, ln1_gamma, ln1_beta, b2, ln2_gamma, ln2_beta]
    o_ref,        # (B*S, H)
):
    x = x_ref[...].astype(jnp.float32)           # (B*S, H)
    mask = mask_ref[...].astype(jnp.float32)     # (B, 1, S)
    additive = (mask - 1.0) * 1e9                # 0 where attend, -1e9 where masked

    vecs = vecs_ref[...].astype(jnp.float32)
    bo, g1, be1, b2, g2, be2 = (vecs[i:i + 1, :] for i in range(6))

    # ---------------- multi-head self attention -----------------------------
    # Fused QKV projection: one (B*S, H) @ (H, 3H) MXU push.
    qkv = jnp.dot(x, wqkv_ref[...], preferred_element_type=jnp.float32) + bqkv_ref[...]

    scale = 1.0 / math.sqrt(HD)
    attn = jnp.zeros((B * S, H), jnp.float32)
    for h in range(NH):  # static unroll over heads; batch dim handled inside einsum
        lo = h * HD
        qh = qkv[:, lo:lo + HD].reshape(B, S, HD)
        kh = qkv[:, H + lo:H + lo + HD].reshape(B, S, HD)
        vh = qkv[:, 2 * H + lo:2 * H + lo + HD].reshape(B, S, HD)

        s = jnp.einsum("bqd,bkd->bqk", qh, kh,
                       preferred_element_type=jnp.float32) * scale   # (B, S, S)
        s = s + additive                                             # broadcast (B,1,S)
        s = s - jnp.max(s, axis=-1, keepdims=True)                   # numerically stable
        p = jnp.exp(s)
        p = p * pl.reciprocal(jnp.sum(p, axis=-1, keepdims=True), approx=True)

        ctx = jnp.einsum("bqk,bkd->bqd", p, vh,
                         preferred_element_type=jnp.float32)         # (B, S, HD)
        # Fold the output projection into the head loop (no lane-axis concat):
        attn = attn + jnp.dot(ctx.reshape(B * S, HD), wo_ref[h],
                              preferred_element_type=jnp.float32)
    attn = attn + bo

    # SubLayer 1: layer_norm(x + dropout(attn)); dropout = identity (eval)
    y = _layer_norm(x + attn, g1, be1)

    # ---------------- feed forward -------------------------------------------
    h1 = jnp.dot(y, w1_ref[...], preferred_element_type=jnp.float32) + b1_ref[...]
    h1 = jnp.maximum(h1, 0.0)  # ReLU
    ff = jnp.dot(h1, w2_ref[...], preferred_element_type=jnp.float32) + b2

    # SubLayer 2: layer_norm(y + dropout(ff))
    o_ref[...] = _layer_norm(y + ff, g2, be2).astype(o_ref.dtype)


# ----------------------------- wrapper ---------------------------------------
def encoder_block(x, mask, params):
    (wq, bq, wk, bk, wv, bv, wo, bo, g1, be1, w1, b1, w2, b2, g2, be2) = params

    # Wrapper-side packing (plain XLA reshapes/concats, done once per call).
    wqkv = jnp.concatenate([wq, wk, wv], axis=1)                   # (H, 3H)
    bqkv = jnp.concatenate([bq, bk, bv], axis=1)                   # (1, 3H)
    wo_h = wo.reshape(NH, HD, H)                                   # per-head Wo slices
    vecs = jnp.concatenate([bo, g1, be1, b2, g2, be2], axis=0)     # (6, H)
    x2 = x.reshape(B * S, H)                                       # flattened 2-D slab

    args = (x2, mask, wqkv, bqkv, wo_h, w1, b1, w2, vecs)

    flops = (2 * B * S * H * 3 * H            # fused QKV projection
             + 2 * B * NH * S * S * HD * 2    # scores + context
             + 2 * B * S * H * H              # output projection
             + 2 * B * S * H * F * 2)         # FFN (two matmuls)
    transcendentals = B * NH * S * S + B * NH * S + 2 * B * S      # exp + recip + rsqrt
    bytes_accessed = int(sum(a.size * a.dtype.itemsize for a in args)
                         + B * S * H * x.dtype.itemsize)
    cost = pl.CostEstimate(flops=int(flops),
                           transcendentals=int(transcendentals),
                           bytes_accessed=bytes_accessed)

    # No grid: the whole problem fits comfortably in VMEM, so every input/output
    # is a single full-array VMEM block and there is exactly one kernel step.
    out = pl.pallas_call(
        encoder_block_kernel,
        out_shape=jax.ShapeDtypeStruct((B * S, H), x.dtype),
        cost_estimate=cost,
    )(*args)
    return out.reshape(B, S, H)


# ----------------------------- pure-JAX reference -----------------------------
def encoder_block_ref(x, mask, params):
    (wq, bq, wk, bk, wv, bv, wo, bo, g1, be1, w1, b1, w2, b2, g2, be2) = params
    additive = (mask - 1.0) * 1e9                      # (B, 1, S)

    q = x @ wq + bq
    k = x @ wk + bk
    v = x @ wv + bv
    qh = q.reshape(B, S, NH, HD).transpose(0, 2, 1, 3)
    kh = k.reshape(B, S, NH, HD).transpose(0, 2, 1, 3)
    vh = v.reshape(B, S, NH, HD).transpose(0, 2, 1, 3)
    s = jnp.einsum("bhqd,bhkd->bhqk", qh, kh) / math.sqrt(HD)
    s = s + additive[:, None, :, :]
    p = jax.nn.softmax(s, axis=-1)
    ctx = jnp.einsum("bhqk,bhkd->bhqd", p, vh).transpose(0, 2, 1, 3).reshape(B, S, H)
    attn_out = ctx @ wo + bo
    y = _layer_norm(x + attn_out, g1, be1)

    h1 = jnp.maximum(y @ w1 + b1, 0.0)
    ff = h1 @ w2 + b2
    return _layer_norm(y + ff, g2, be2)


# ----------------------------- main -------------------------------------------
if __name__ == "__main__":
    key = jax.random.PRNGKey(0)
    keys = jax.random.split(key, 8)

    def w(k, shape):
        return (jax.random.normal(k, shape, dtype=jnp.float32) * 0.02)

    wq = w(keys[0], (H, H)); bq = jnp.zeros((1, H), jnp.float32)
    wk = w(keys[1], (H, H)); bk = jnp.zeros((1, H), jnp.float32)
    wv = w(keys[2], (H, H)); bv = jnp.zeros((1, H), jnp.float32)
    wo = w(keys[3], (H, H)); bo = jnp.zeros((1, H), jnp.float32)
    g1 = jnp.ones((1, H), jnp.float32); be1 = jnp.zeros((1, H), jnp.float32)
    w1 = w(keys[4], (H, F)); b1 = jnp.zeros((1, F), jnp.float32)
    w2 = w(keys[5], (F, H)); b2 = jnp.zeros((1, H), jnp.float32)
    g2 = jnp.ones((1, H), jnp.float32); be2 = jnp.zeros((1, H), jnp.float32)
    params = (wq, bq, wk, bk, wv, bv, wo, bo, g1, be1, w1, b1, w2, b2, g2, be2)

    x = jax.random.normal(keys[6], (B, S, H), dtype=jnp.float32)
    # attention_mask: 1 = attend, 0 = padding (last 2 tokens of batch 1 padded)
    mask = jnp.ones((B, 1, S), dtype=jnp.float32)
    mask = mask.at[1, 0, -2:].set(0.0)

    out = encoder_block(x, mask, params)
    out = jax.block_until_ready(out)

    ref = encoder_block_ref(x, mask, params)
    assert out.shape == (B, S, H)
    # Tolerance loosened slightly vs exact f32 because the softmax denominator
    # uses the EUP approximate reciprocal (pl.reciprocal(approx=True)).
    assert jnp.allclose(out, ref, atol=2e-3, rtol=2e-3), "mismatch vs reference"

    print("KERNEL_OK")
</pallas_src>

<mosaic_0001>
module attributes {stable_mosaic.version = 11 : i64} {
  func.func @encoder_block_kernel(%arg0: memref<16x32xf32, #tpu.memory_space<vmem>>, %arg1: memref<2x1x8xf32, #tpu.memory_space<vmem>>, %arg2: memref<32x96xf32, #tpu.memory_space<vmem>>, %arg3: memref<1x96xf32, #tpu.memory_space<vmem>>, %arg4: memref<4x8x32xf32, #tpu.memory_space<vmem>>, %arg5: memref<32x128xf32, #tpu.memory_space<vmem>>, %arg6: memref<1x128xf32, #tpu.memory_space<vmem>>, %arg7: memref<128x32xf32, #tpu.memory_space<vmem>>, %arg8: memref<6x32xf32, #tpu.memory_space<vmem>>, %arg9: memref<16x32xf32, #tpu.memory_space<vmem>>) attributes {dimension_semantics = [], scalar_prefetch = 0 : i64, scratch_operands = 0 : i64, tpu.core_type = #tpu.core_type<tc>} {
    %c0 = arith.constant 0 : index
    %c0_0 = arith.constant 0 : index
    %0 = vector.load %arg0[%c0, %c0_0] : memref<16x32xf32, #tpu.memory_space<vmem>>, vector<16x32xf32>
    %c0_1 = arith.constant 0 : index
    %c0_2 = arith.constant 0 : index
    %c0_3 = arith.constant 0 : index
    %1 = vector.load %arg1[%c0_1, %c0_2, %c0_3] : memref<2x1x8xf32, #tpu.memory_space<vmem>>, vector<2x1x8xf32>
    %cst = arith.constant 1.000000e+00 : f32
    %2 = vector.broadcast %cst : f32 to vector<2x1x8xf32>
    %3 = arith.subf %1, %2 : vector<2x1x8xf32>
    %cst_4 = arith.constant 1.000000e+09 : f32
    %4 = vector.broadcast %cst_4 : f32 to vector<2x1x8xf32>
    %5 = arith.mulf %3, %4 : vector<2x1x8xf32>
    %c0_5 = arith.constant 0 : index
    %c0_6 = arith.constant 0 : index
    %6 = vector.load %arg8[%c0_5, %c0_6] : memref<6x32xf32, #tpu.memory_space<vmem>>, vector<6x32xf32>
    %7 = vector.extract_strided_slice %6 {offsets = [0, 0], sizes = [1, 32], strides = [1, 1]} : vector<6x32xf32> to vector<1x32xf32>
    %8 = vector.extract_strided_slice %6 {offsets = [1, 0], sizes = [1, 32], strides = [1, 1]} : vector<6x32xf32> to vector<1x32xf32>
    %9 = vector.extract_strided_slice %6 {offsets = [2, 0], sizes = [1, 32], strides = [1, 1]} : vector<6x32xf32> to vector<1x32xf32>
    %10 = vector.extract_strided_slice %6 {offsets = [3, 0], sizes = [1, 32], strides = [1, 1]} : vector<6x32xf32> to vector<1x32xf32>
    %11 = vector.extract_strided_slice %6 {offsets = [4, 0], sizes = [1, 32], strides = [1, 1]} : vector<6x32xf32> to vector<1x32xf32>
    %12 = vector.extract_strided_slice %6 {offsets = [5, 0], sizes = [1, 32], strides = [1, 1]} : vector<6x32xf32> to vector<1x32xf32>
    %c0_7 = arith.constant 0 : index
    %c0_8 = arith.constant 0 : index
    %13 = vector.load %arg2[%c0_7, %c0_8] : memref<32x96xf32, #tpu.memory_space<vmem>>, vector<32x96xf32>
    %cst_9 = arith.constant dense<0.000000e+00> : vector<16x96xf32>
    %14 = tpu.matmul %0, %13, %cst_9 {dimension_numbers = #tpu.dot_dimension_numbers<[1], [0], [0], [1], [0, 0, 1, 1], [], []>} : vector<16x32xf32>, vector<32x96xf32>, vector<16x96xf32> -> vector<16x96xf32>
    %c0_10 = arith.constant 0 : index
    %c0_11 = arith.constant 0 : index
    %15 = vector.load %arg3[%c0_10, %c0_11] : memref<1x96xf32, #tpu.memory_space<vmem>>, vector<1x96xf32>
    %16 = vector.broadcast %15 : vector<1x96xf32> to vector<16x96xf32>
    %17 = arith.addf %14, %16 : vector<16x96xf32>
    %cst_12 = arith.constant 0.000000e+00 : f32
    %18 = vector.broadcast %cst_12 : f32 to vector<16x32xf32>
    %19 = vector.extract_strided_slice %17 {offsets = [0, 0], sizes = [16, 8], strides = [1, 1]} : vector<16x96xf32> to vector<16x8xf32>
    %20 = vector.shape_cast %19 : vector<16x8xf32> to vector<2x8x8xf32>
    %21 = vector.extract_strided_slice %17 {offsets = [0, 32], sizes = [16, 8], strides = [1, 1]} : vector<16x96xf32> to vector<16x8xf32>
    %22 = vector.shape_cast %21 : vector<16x8xf32> to vector<2x8x8xf32>
    %23 = vector.extract_strided_slice %17 {offsets = [0, 64], sizes = [16, 8], strides = [1, 1]} : vector<16x96xf32> to vector<16x8xf32>
    %24 = vector.shape_cast %23 : vector<16x8xf32> to vector<2x8x8xf32>
    "tpu.trace_start"() <{level = 10 : i32, message = "bqd,bkd->bqk"}> : () -> ()
    %cst_13 = arith.constant dense<0.000000e+00> : vector<2x8x8xf32>
    %25 = tpu.matmul %20, %22, %cst_13 {dimension_numbers = #tpu.dot_dimension_numbers<[2], [2], [1], [1], [0, 0, 0, 1, 1, 1], [0], [0]>} : vector<2x8x8xf32>, vector<2x8x8xf32>, vector<2x8x8xf32> -> vector<2x8x8xf32>
    "tpu.trace_stop"() : () -> ()
    %cst_14 = arith.constant 0.353553385 : f32
    %26 = vector.broadcast %cst_14 : f32 to vector<2x8x8xf32>
    %27 = arith.mulf %25, %26 : vector<2x8x8xf32>
    %28 = vector.broadcast %5 : vector<2x1x8xf32> to vector<2x8x8xf32>
    %29 = arith.addf %27, %28 : vector<2x8x8xf32>
    %cst_15 = arith.constant dense<0xFF800000> : vector<2x8xf32>
    %30 = vector.multi_reduction <maximumf>, %29, %cst_15 [2] : vector<2x8x8xf32> to vector<2x8xf32>
    %31 = vector.shape_cast %30 : vector<2x8xf32> to vector<2x8x1xf32>
    %32 = vector.broadcast %31 : vector<2x8x1xf32> to vector<2x8x8xf32>
    %33 = arith.subf %29, %32 : vector<2x8x8xf32>
    %34 = math.exp %33 : vector<2x8x8xf32>
    %cst_16 = arith.constant dense<0.000000e+00> : vector<2x8xf32>
    %35 = vector.multi_reduction <add>, %34, %cst_16 [2] : vector<2x8x8xf32> to vector<2x8xf32>
    %36 = vector.shape_cast %35 : vector<2x8xf32> to vector<2x8x1xf32>
    %37 = tpu.reciprocal %36 {approx = true} : vector<2x8x1xf32> -> vector<2x8x1xf32>
    %38 = vector.broadcast %37 : vector<2x8x1xf32> to vector<2x8x8xf32>
    %39 = arith.mulf %34, %38 : vector<2x8x8xf32>
    "tpu.trace_start"() <{level = 10 : i32, message = "bqk,bkd->bqd"}> : () -> ()
    %cst_17 = arith.constant dense<0.000000e+00> : vector<2x8x8xf32>
    %40 = tpu.matmul %39, %24, %cst_17 {dimension_numbers = #tpu.dot_dimension_numbers<[2], [1], [1], [2], [0, 0, 0, 1, 1, 2], [0], [0]>} : vector<2x8x8xf32>, vector<2x8x8xf32>, vector<2x8x8xf32> -> vector<2x8x8xf32>
    "tpu.trace_stop"() : () -> ()
    %41 = vector.shape_cast %40 : vector<2x8x8xf32> to vector<16x8xf32>
    %c0_18 = arith.constant 0 : index
    %c0_19 = arith.constant 0 : index
    %c0_20 = arith.constant 0 : index
    %42 = vector.load %arg4[%c0_18, %c0_19, %c0_20] : memref<4x8x32xf32, #tpu.memory_space<vmem>>, vector<1x8x32xf32>
    %43 = vector.shape_cast %42 : vector<1x8x32xf32> to vector<8x32xf32>
    %cst_21 = arith.constant dense<0.000000e+00> : vector<16x32xf32>
    %44 = tpu.matmul %41, %43, %cst_21 {dimension_numbers = #tpu.dot_dimension_numbers<[1], [0], [0], [1], [0, 0, 1, 1], [], []>} : vector<16x8xf32>, vector<8x32xf32>, vector<16x32xf32> -> vector<16x32xf32>
    %45 = arith.addf %18, %44 : vector<16x32xf32>
    %46 = vector.extract_strided_slice %17 {offsets = [0, 8], sizes = [16, 8], strides = [1, 1]} : vector<16x96xf32> to vector<16x8xf32>
    %47 = vector.shape_cast %46 : vector<16x8xf32> to vector<2x8x8xf32>
    %48 = vector.extract_strided_slice %17 {offsets = [0, 40], sizes = [16, 8], strides = [1, 1]} : vector<16x96xf32> to vector<16x8xf32>
    %49 = vector.shape_cast %48 : vector<16x8xf32> to vector<2x8x8xf32>
    %50 = vector.extract_strided_slice %17 {offsets = [0, 72], sizes = [16, 8], strides = [1, 1]} : vector<16x96xf32> to vector<16x8xf32>
    %51 = vector.shape_cast %50 : vector<16x8xf32> to vector<2x8x8xf32>
    "tpu.trace_start"() <{level = 10 : i32, message = "bqd,bkd->bqk"}> : () -> ()
    %cst_22 = arith.constant dense<0.000000e+00> : vector<2x8x8xf32>
    %52 = tpu.matmul %47, %49, %cst_22 {dimension_numbers = #tpu.dot_dimension_numbers<[2], [2], [1], [1], [0, 0, 0, 1, 1, 1], [0], [0]>} : vector<2x8x8xf32>, vector<2x8x8xf32>, vector<2x8x8xf32> -> vector<2x8x8xf32>
    "tpu.trace_stop"() : () -> ()
    %cst_23 = arith.constant 0.353553385 : f32
    %53 = vector.broadcast %cst_23 : f32 to vector<2x8x8xf32>
    %54 = arith.mulf %52, %53 : vector<2x8x8xf32>
    %55 = vector.broadcast %5 : vector<2x1x8xf32> to vector<2x8x8xf32>
    %56 = arith.addf %54, %55 : vector<2x8x8xf32>
    %cst_24 = arith.constant dense<0xFF800000> : vector<2x8xf32>
    %57 = vector.multi_reduction <maximumf>, %56, %cst_24 [2] : vector<2x8x8xf32> to vector<2x8xf32>
    %58 = vector.shape_cast %57 : vector<2x8xf32> to vector<2x8x1xf32>
    %59 = vector.broadcast %58 : vector<2x8x1xf32> to vector<2x8x8xf32>
    %60 = arith.subf %56, %59 : vector<2x8x8xf32>
    %61 = math.exp %60 : vector<2x8x8xf32>
    %cst_25 = arith.constant dense<0.000000e+00> : vector<2x8xf32>
    %62 = vector.multi_reduction <add>, %61, %cst_25 [2] : vector<2x8x8xf32> to vector<2x8xf32>
    %63 = vector.shape_cast %62 : vector<2x8xf32> to vector<2x8x1xf32>
    %64 = tpu.reciprocal %63 {approx = true} : vector<2x8x1xf32> -> vector<2x8x1xf32>
    %65 = vector.broadcast %64 : vector<2x8x1xf32> to vector<2x8x8xf32>
    %66 = arith.mulf %61, %65 : vector<2x8x8xf32>
    "tpu.trace_start"() <{level = 10 : i32, message = "bqk,bkd->bqd"}> : () -> ()
    %cst_26 = arith.constant dense<0.000000e+00> : vector<2x8x8xf32>
    %67 = tpu.matmul %66, %51, %cst_26 {dimension_numbers = #tpu.dot_dimension_numbers<[2], [1], [1], [2], [0, 0, 0, 1, 1, 2], [0], [0]>} : vector<2x8x8xf32>, vector<2x8x8xf32>, vector<2x8x8xf32> -> vector<2x8x8xf32>
    "tpu.trace_stop"() : () -> ()
    %68 = vector.shape_cast %67 : vector<2x8x8xf32> to vector<16x8xf32>
    %c1 = arith.constant 1 : index
    %c0_27 = arith.constant 0 : index
    %c0_28 = arith.constant 0 : index
    %69 = vector.load %arg4[%c1, %c0_27, %c0_28] : memref<4x8x32xf32, #tpu.memory_space<vmem>>, vector<1x8x32xf32>
    %70 = vector.shape_cast %69 : vector<1x8x32xf32> to vector<8x32xf32>
    %cst_29 = arith.constant dense<0.000000e+00> : vector<16x32xf32>
    %71 = tpu.matmul %68, %70, %cst_29 {dimension_numbers = #tpu.dot_dimension_numbers<[1], [0], [0], [1], [0, 0, 1, 1], [], []>} : vector<16x8xf32>, vector<8x32xf32>, vector<16x32xf32> -> vector<16x32xf32>
    %72 = arith.addf %45, %71 : vector<16x32xf32>
    %73 = vector.extract_strided_slice %17 {offsets = [0, 16], sizes = [16, 8], strides = [1, 1]} : vector<16x96xf32> to vector<16x8xf32>
    %74 = vector.shape_cast %73 : vector<16x8xf32> to vector<2x8x8xf32>
    %75 = vector.extract_strided_slice %17 {offsets = [0, 48], sizes = [16, 8], strides = [1, 1]} : vector<16x96xf32> to vector<16x8xf32>
    %76 = vector.shape_cast %75 : vector<16x8xf32> to vector<2x8x8xf32>
    %77 = vector.extract_strided_slice %17 {offsets = [0, 80], sizes = [16, 8], strides = [1, 1]} : vector<16x96xf32> to vector<16x8xf32>
    %78 = vector.shape_cast %77 : vector<16x8xf32> to vector<2x8x8xf32>
    "tpu.trace_start"() <{level = 10 : i32, message = "bqd,bkd->bqk"}> : () -> ()
    %cst_30 = arith.constant dense<0.000000e+00> : vector<2x8x8xf32>
    %79 = tpu.matmul %74, %76, %cst_30 {dimension_numbers = #tpu.dot_dimension_numbers<[2], [2], [1], [1], [0, 0, 0, 1, 1, 1], [0], [0]>} : vector<2x8x8xf32>, vector<2x8x8xf32>, vector<2x8x8xf32> -> vector<2x8x8xf32>
    "tpu.trace_stop"() : () -> ()
    %cst_31 = arith.constant 0.353553385 : f32
    %80 = vector.broadcast %cst_31 : f32 to vector<2x8x8xf32>
    %81 = arith.mulf %79, %80 : vector<2x8x8xf32>
    %82 = vector.broadcast %5 : vector<2x1x8xf32> to vector<2x8x8xf32>
    %83 = arith.addf %81, %82 : vector<2x8x8xf32>
    %cst_32 = arith.constant dense<0xFF800000> : vector<2x8xf32>
    %84 = vector.multi_reduction <maximumf>, %83, %cst_32 [2] : vector<2x8x8xf32> to vector<2x8xf32>
    %85 = vector.shape_cast %84 : vector<2x8xf32> to vector<2x8x1xf32>
    %86 = vector.broadcast %85 : vector<2x8x1xf32> to vector<2x8x8xf32>
    %87 = arith.subf %83, %86 : vector<2x8x8xf32>
    %88 = math.exp %87 : vector<2x8x8xf32>
    %cst_33 = arith.constant dense<0.000000e+00> : vector<2x8xf32>
    %89 = vector.multi_reduction <add>, %88, %cst_33 [2] : vector<2x8x8xf32> to vector<2x8xf32>
    %90 = vector.shape_cast %89 : vector<2x8xf32> to vector<2x8x1xf32>
    %91 = tpu.reciprocal %90 {approx = true} : vector<2x8x1xf32> -> vector<2x8x1xf32>
    %92 = vector.broadcast %91 : vector<2x8x1xf32> to vector<2x8x8xf32>
    %93 = arith.mulf %88, %92 : vector<2x8x8xf32>
    "tpu.trace_start"() <{level = 10 : i32, message = "bqk,bkd->bqd"}> : () -> ()
    %cst_34 = arith.constant dense<0.000000e+00> : vector<2x8x8xf32>
    %94 = tpu.matmul %93, %78, %cst_34 {dimension_numbers = #tpu.dot_dimension_numbers<[2], [1], [1], [2], [0, 0, 0, 1, 1, 2], [0], [0]>} : vector<2x8x8xf32>, vector<2x8x8xf32>, vector<2x8x8xf32> -> vector<2x8x8xf32>
    "tpu.trace_stop"() : () -> ()
    %95 = vector.shape_cast %94 : vector<2x8x8xf32> to vector<16x8xf32>
    %c2 = arith.constant 2 : index
    %c0_35 = arith.constant 0 : index
    %c0_36 = arith.constant 0 : index
    %96 = vector.load %arg4[%c2, %c0_35, %c0_36] : memref<4x8x32xf32, #tpu.memory_space<vmem>>, vector<1x8x32xf32>
    %97 = vector.shape_cast %96 : vector<1x8x32xf32> to vector<8x32xf32>
    %cst_37 = arith.constant dense<0.000000e+00> : vector<16x32xf32>
    %98 = tpu.matmul %95, %97, %cst_37 {dimension_numbers = #tpu.dot_dimension_numbers<[1], [0], [0], [1], [0, 0, 1, 1], [], []>} : vector<16x8xf32>, vector<8x32xf32>, vector<16x32xf32> -> vector<16x32xf32>
    %99 = arith.addf %72, %98 : vector<16x32xf32>
    %100 = vector.extract_strided_slice %17 {offsets = [0, 24], sizes = [16, 8], strides = [1, 1]} : vector<16x96xf32> to vector<16x8xf32>
    %101 = vector.shape_cast %100 : vector<16x8xf32> to vector<2x8x8xf32>
    %102 = vector.extract_strided_slice %17 {offsets = [0, 56], sizes = [16, 8], strides = [1, 1]} : vector<16x96xf32> to vector<16x8xf32>
    %103 = vector.shape_cast %102 : vector<16x8xf32> to vector<2x8x8xf32>
    %104 = vector.extract_strided_slice %17 {offsets = [0, 88], sizes = [16, 8], strides = [1, 1]} : vector<16x96xf32> to vector<16x8xf32>
    %105 = vector.shape_cast %104 : vector<16x8xf32> to vector<2x8x8xf32>
    "tpu.trace_start"() <{level = 10 : i32, message = "bqd,bkd->bqk"}> : () -> ()
    %cst_38 = arith.constant dense<0.000000e+00> : vector<2x8x8xf32>
    %106 = tpu.matmul %101, %103, %cst_38 {dimension_numbers = #tpu.dot_dimension_numbers<[2], [2], [1], [1], [0, 0, 0, 1, 1, 1], [0], [0]>} : vector<2x8x8xf32>, vector<2x8x8xf32>, vector<2x8x8xf32> -> vector<2x8x8xf32>
    "tpu.trace_stop"() : () -> ()
    %cst_39 = arith.constant 0.353553385 : f32
    %107 = vector.broadcast %cst_39 : f32 to vector<2x8x8xf32>
    %108 = arith.mulf %106, %107 : vector<2x8x8xf32>
    %109 = vector.broadcast %5 : vector<2x1x8xf32> to vector<2x8x8xf32>
    %110 = arith.addf %108, %109 : vector<2x8x8xf32>
    %cst_40 = arith.constant dense<0xFF800000> : vector<2x8xf32>
    %111 = vector.multi_reduction <maximumf>, %110, %cst_40 [2] : vector<2x8x8xf32> to vector<2x8xf32>
    %112 = vector.shape_cast %111 : vector<2x8xf32> to vector<2x8x1xf32>
    %113 = vector.broadcast %112 : vector<2x8x1xf32> to vector<2x8x8xf32>
    %114 = arith.subf %110, %113 : vector<2x8x8xf32>
    %115 = math.exp %114 : vector<2x8x8xf32>
    %cst_41 = arith.constant dense<0.000000e+00> : vector<2x8xf32>
    %116 = vector.multi_reduction <add>, %115, %cst_41 [2] : vector<2x8x8xf32> to vector<2x8xf32>
    %117 = vector.shape_cast %116 : vector<2x8xf32> to vector<2x8x1xf32>
    %118 = tpu.reciprocal %117 {approx = true} : vector<2x8x1xf32> -> vector<2x8x1xf32>
    %119 = vector.broadcast %118 : vector<2x8x1xf32> to vector<2x8x8xf32>
    %120 = arith.mulf %115, %119 : vector<2x8x8xf32>
    "tpu.trace_start"() <{level = 10 : i32, message = "bqk,bkd->bqd"}> : () -> ()
    %cst_42 = arith.constant dense<0.000000e+00> : vector<2x8x8xf32>
    %121 = tpu.matmul %120, %105, %cst_42 {dimension_numbers = #tpu.dot_dimension_numbers<[2], [1], [1], [2], [0, 0, 0, 1, 1, 2], [0], [0]>} : vector<2x8x8xf32>, vector<2x8x8xf32>, vector<2x8x8xf32> -> vector<2x8x8xf32>
    "tpu.trace_stop"() : () -> ()
    %122 = vector.shape_cast %121 : vector<2x8x8xf32> to vector<16x8xf32>
    %c3 = arith.constant 3 : index
    %c0_43 = arith.constant 0 : index
    %c0_44 = arith.constant 0 : index
    %123 = vector.load %arg4[%c3, %c0_43, %c0_44] : memref<4x8x32xf32, #tpu.memory_space<vmem>>, vector<1x8x32xf32>
    %124 = vector.shape_cast %123 : vector<1x8x32xf32> to vector<8x32xf32>
    %cst_45 = arith.constant dense<0.000000e+00> : vector<16x32xf32>
    %125 = tpu.matmul %122, %124, %cst_45 {dimension_numbers = #tpu.dot_dimension_numbers<[1], [0], [0], [1], [0, 0, 1, 1], [], []>} : vector<16x8xf32>, vector<8x32xf32>, vector<16x32xf32> -> vector<16x32xf32>
    %126 = arith.addf %99, %125 : vector<16x32xf32>
    %127 = vector.broadcast %7 : vector<1x32xf32> to vector<16x32xf32>
    %128 = arith.addf %126, %127 : vector<16x32xf32>
    %129 = arith.addf %0, %128 : vector<16x32xf32>
    %cst_46 = arith.constant dense<0.000000e+00> : vector<16xf32>
    %130 = vector.multi_reduction <add>, %129, %cst_46 [1] : vector<16x32xf32> to vector<16xf32>
    %131 = vector.shape_cast %130 : vector<16xf32> to vector<16x1xf32>
    %cst_47 = arith.constant 3.200000e+01 : f32
    %132 = vector.broadcast %cst_47 : f32 to vector<16x1xf32>
    %133 = arith.divf %131, %132 : vector<16x1xf32>
    %134 = vector.broadcast %133 : vector<16x1xf32> to vector<16x32xf32>
    %135 = arith.subf %129, %134 : vector<16x32xf32>
    %136 = arith.mulf %135, %135 : vector<16x32xf32>
    %cst_48 = arith.constant dense<0.000000e+00> : vector<16xf32>
    %137 = vector.multi_reduction <add>, %136, %cst_48 [1] : vector<16x32xf32> to vector<16xf32>
    %138 = vector.shape_cast %137 : vector<16xf32> to vector<16x1xf32>
    %cst_49 = arith.constant 3.200000e+01 : f32
    %139 = vector.broadcast %cst_49 : f32 to vector<16x1xf32>
    %140 = arith.divf %138, %139 : vector<16x1xf32>
    %141 = vector.broadcast %133 : vector<16x1xf32> to vector<16x32xf32>
    %142 = arith.subf %129, %141 : vector<16x32xf32>
    %cst_50 = arith.constant 9.99999974E-6 : f32
    %143 = vector.broadcast %cst_50 : f32 to vector<16x1xf32>
    %144 = arith.addf %140, %143 : vector<16x1xf32>
    %145 = math.rsqrt %144 : vector<16x1xf32>
    %146 = vector.broadcast %145 : vector<16x1xf32> to vector<16x32xf32>
    %147 = arith.mulf %142, %146 : vector<16x32xf32>
    %148 = vector.broadcast %8 : vector<1x32xf32> to vector<16x32xf32>
    %149 = arith.mulf %147, %148 : vector<16x32xf32>
    %150 = vector.broadcast %9 : vector<1x32xf32> to vector<16x32xf32>
    %151 = arith.addf %149, %150 : vector<16x32xf32>
    %c0_51 = arith.constant 0 : index
    %c0_52 = arith.constant 0 : index
    %152 = vector.load %arg5[%c0_51, %c0_52] : memref<32x128xf32, #tpu.memory_space<vmem>>, vector<32x128xf32>
    %cst_53 = arith.constant dense<0.000000e+00> : vector<16x128xf32>
    %153 = tpu.matmul %151, %152, %cst_53 {dimension_numbers = #tpu.dot_dimension_numbers<[1], [0], [0], [1], [0, 0, 1, 1], [], []>} : vector<16x32xf32>, vector<32x128xf32>, vector<16x128xf32> -> vector<16x128xf32>
    %c0_54 = arith.constant 0 : index
    %c0_55 = arith.constant 0 : index
    %154 = vector.load %arg6[%c0_54, %c0_55] : memref<1x128xf32, #tpu.memory_space<vmem>>, vector<1x128xf32>
    %155 = vector.broadcast %154 : vector<1x128xf32> to vector<16x128xf32>
    %156 = arith.addf %153, %155 : vector<16x128xf32>
    %cst_56 = arith.constant 0.000000e+00 : f32
    %157 = vector.broadcast %cst_56 : f32 to vector<16x128xf32>
    %158 = arith.maximumf %156, %157 : vector<16x128xf32>
    %c0_57 = arith.constant 0 : index
    %c0_58 = arith.constant 0 : index
    %159 = vector.load %arg7[%c0_57, %c0_58] : memref<128x32xf32, #tpu.memory_space<vmem>>, vector<128x32xf32>
    %cst_59 = arith.constant dense<0.000000e+00> : vector<16x32xf32>
    %160 = tpu.matmul %158, %159, %cst_59 {dimension_numbers = #tpu.dot_dimension_numbers<[1], [0], [0], [1], [0, 0, 1, 1], [], []>} : vector<16x128xf32>, vector<128x32xf32>, vector<16x32xf32> -> vector<16x32xf32>
    %161 = vector.broadcast %10 : vector<1x32xf32> to vector<16x32xf32>
    %162 = arith.addf %160, %161 : vector<16x32xf32>
    %163 = arith.addf %151, %162 : vector<16x32xf32>
    %cst_60 = arith.constant dense<0.000000e+00> : vector<16xf32>
    %164 = vector.multi_reduction <add>, %163, %cst_60 [1] : vector<16x32xf32> to vector<16xf32>
    %165 = vector.shape_cast %164 : vector<16xf32> to vector<16x1xf32>
    %cst_61 = arith.constant 3.200000e+01 : f32
    %166 = vector.broadcast %cst_61 : f32 to vector<16x1xf32>
    %167 = arith.divf %165, %166 : vector<16x1xf32>
    %168 = vector.broadcast %167 : vector<16x1xf32> to vector<16x32xf32>
    %169 = arith.subf %163, %168 : vector<16x32xf32>
    %170 = arith.mulf %169, %169 : vector<16x32xf32>
    %cst_62 = arith.constant dense<0.000000e+00> : vector<16xf32>
    %171 = vector.multi_reduction <add>, %170, %cst_62 [1] : vector<16x32xf32> to vector<16xf32>
    %172 = vector.shape_cast %171 : vector<16xf32> to vector<16x1xf32>
    %cst_63 = arith.constant 3.200000e+01 : f32
    %173 = vector.broadcast %cst_63 : f32 to vector<16x1xf32>
    %174 = arith.divf %172, %173 : vector<16x1xf32>
    %175 = vector.broadcast %167 : vector<16x1xf32> to vector<16x32xf32>
    %176 = arith.subf %163, %175 : vector<16x32xf32>
    %cst_64 = arith.constant 9.99999974E-6 : f32
    %177 = vector.broadcast %cst_64 : f32 to vector<16x1xf32>
    %178 = arith.addf %174, %177 : vector<16x1xf32>
    %179 = math.rsqrt %178 : vector<16x1xf32>
    %180 = vector.broadcast %179 : vector<16x1xf32> to vector<16x32xf32>
    %181 = arith.mulf %176, %180 : vector<16x32xf32>
    %182 = vector.broadcast %11 : vector<1x32xf32> to vector<16x32xf32>
    %183 = arith.mulf %181, %182 : vector<16x32xf32>
    %184 = vector.broadcast %12 : vector<1x32xf32> to vector<16x32xf32>
    %185 = arith.addf %183, %184 : vector<16x32xf32>
    %c0_65 = arith.constant 0 : index
    %c0_66 = arith.constant 0 : index
    %186 = vector.load %arg9[%c0_65, %c0_66] : memref<16x32xf32, #tpu.memory_space<vmem>>, vector<16x32xf32>
    tpu.vector_store %arg9[%c0_65, %c0_66], %185 {strides = array<i32>} : memref<16x32xf32, #tpu.memory_space<vmem>>, vector<16x32xf32>,
    return
  }
}

</mosaic_0001>

<bundles_post_ra>
// kernel: tpu_custom_call.1
= control target key start
LH: loop header
LB: loop body
LE: loop exit
PB: predicated region body
PF: predicated region fallthrough
CT: control target
= control target key end

     0   :  { %vm53_vm0 = vcmask 261120   ;;  %s2840_s0 = inlined_call_operand.vmem [shape: f32[16,32], index: 0, kind: input, shape index: {}]   ;;  %s2841_s1 = inlined_call_operand.vmem [shape: f32[2,1,8], index: 1, kind: input, shape index: {}]   ;;  %s2842_s2 = inlined_call_operand.vmem [shape: f32[32,96], index: 2, kind: input, shape index: {}]   ;;  %s2843_s3 = inlined_call_operand.vmem [shape: f32[1,96], index: 3, kind: input, shape index: {}]   ;;  %s2844_s4 = inlined_call_operand.vmem [shape: f32[4,8,32], index: 4, kind: input, shape index: {}]   ;;  %s2845_s5 = inlined_call_operand.vmem [shape: f32[32,128], index: 5, kind: input, shape index: {}]   ;;  %s2846_s6 = inlined_call_operand.vmem [shape: f32[1,128], index: 6, kind: input, shape index: {}]   ;;  %s2847_s7 = inlined_call_operand.vmem [shape: f32[128,32], index: 7, kind: input, shape index: {}]   ;;  %s2848_s8 = inlined_call_operand.vmem [shape: f32[6,32], index: 8, kind: input, shape index: {}]   ;;  %s2849_s9 = inlined_call_operand.hbm [shape: f32[16,32], index: 9, kind: output, shape index: {}]  }
   0x1   :  { %v45_v0 = vld [vmem:[%s2842_s2 + $0x18] sm:$0xff]  ;;  %v44_v1 = vld [vmem:[%s2842_s2 + $0x10] sm:$0xff]  ;;  %v2538_v2 = vld [vmem:[%s2840_s0] sm:$0xff] }
   0x2   :  { %2228 = vmatprep.subr.mxu0 %v45_v0  ;;  %v43_v3 = vld [vmem:[%s2842_s2 + $0x8] sm:$0xff]  ;;  %2236 = vmatprep.mubr.msk.f32.mxu0 %vm53_vm0, %v2538_v2 }
   0x3   :  { %2229 = vmatpush3.msra.mxu0 %v45_v0 }
   0x4   :  { %14 = vsyncpa [#allocation3], 0  ;;  %2230 = vmatprep.subr.mxu0 %v44_v1  ;;  %v42_v4 = vld [vmem:[%s2842_s2] sm:$0xff]  ;;  %v2551_v5 = vld [vmem:[%s2840_s0 + $0x8] sm:$0xff]  ;;  %v2463_v6 = vmov 0.0   ;;  %vm2464_vm1 = vmmov 0   ;;  %v294_v14 = vlaneseq }
   0x5   :  { %2231 = vmatpush3.msra.mxu0 %v44_v1  ;;  %2264 = vmatprep.subr.mxu1 %v2463_v6  ;;  %v2113_v8 = vld [vmem:[%s2843_s3] ss:$0 sm:$0xff]  ;;  %s2465_s21 = smov 96   ;;  %vm138_vm2 = vcmask 64512   ;;  %v36_v18 = vld [vmem:[%s2841_s1 + $0x1] sm:$0x1] }
   0x6   :  { %2232 = vmatprep.subr.mxu0 %v43_v3  ;;  %2266 = vmatprep.mubr.msk.f32.mxu1 %vm2464_vm1, %v2463_v6  ;;  %v35_v15 = vld [vmem:[%s2841_s1] sm:$0x1]  ;;  %v2585_v17 = vshrl.u32 %v294_v14, 7  ;;  %v2112_v21 = vadd.f32 -1.0, %v36_v18  ;;  %s2466_s1 = smov 64   ;;  %s2467_s25 = smov 88  }
   0x7   :  { %2233 = vmatpush3.msra.mxu0 %v43_v3  ;;  %v2111_v16 = vadd.f32 -1.0, %v35_v15  ;;  %s2468_s26 = smov 120   ;;  %s2469_s27 = smov 56  }
   0x8   :  { %2234 = vmatprep.subr.mxu0 %v42_v4  ;;  %v2591_v20 = vsub.s32 0, %v2585_v17  ;;  %v40_v23 = vmul.f32 1e+09, %v2112_v21  ;;  %s2470_s28 = smov 112   ;;  %s2471_s10 = smov 80  }
   0x9   :  { %2235 = vmatpush3.msra.mxu0 %v42_v4  ;;  %v39_v19 = vmul.f32 1e+09, %v2111_v16  ;;  %s2472_s13 = smov 48   ;;  %s2473_s14 = smov 72  }
   0xa   :  { %2237 = vmatmul.mubr.msk.f32.vlgmr.msra.gmra.mxu0 %vm53_vm0, %v2551_v5  ;;  %2239 = vmatprep.subr.mxu0 %v2463_v6  ;;  %v2598_v28 = vrot.slane %v40_v23, %v2591_v20  ;;  %s2474_s15 = smov 104   ;;  %s2475_s18 = smov 40  }
   0xb   :  { %2241 = vmatprep.mubr.msk.f32.mxu0 %vm2464_vm1, %v2463_v6  ;;  %v2594_v22 = vrot.slane %v39_v19, %v2591_v20 }
  0xca   :  { %v2238_v7 = vpop.f32.mrf.mxu0 }
  0xcb   :  { %v2567_v11 = vadd.f32 %v2238_v7, %v2113_v8 }
  0xcc   :  { %v126_v9 = vpop.f32.mrf.mxu0 }
  0xcd   :  { %v2564_v10 = vadd.f32 %v2113_v8, %v126_v9 }
  0xcf   :  { %136 = vrot.lane.b32.xlu0 %v2564_v10, %s2465_s21 }
  0xd3   :  { %214 = vrot.lane.b32.xlu0 %v2567_v11, %s2465_s21 }
 0x141   :  { %v137_v12 = vpop.permute.xlu0 %136 }
 0x142   :  { %2240 = vmatpush3.xpose.msk.msra.mxu0 %vm138_vm2, %v137_v12 }
 0x143   :  { %2244 = vmatprep.subr.mxu0 %v2463_v6 }
 0x145   :  { %2242 = vmatmul.mubr.msk.f32.vlgmr.msra.gmra.mxu0 %vm138_vm2, %v2564_v10  ;;  %v215_v13 = vpop.permute.xlu0 %214 }
 0x146   :  { %2245 = vmatpush3.xpose.msk.msra.mxu0 %vm138_vm2, %v215_v13  ;;  %2246 = vmatprep.mubr.msk.f32.mxu0 %vm2464_vm1, %v2463_v6 }
 0x147   :  { %2249 = vmatprep.subr.mxu0 %v2463_v6 }
 0x149   :  { %2247 = vmatmul.mubr.msk.f32.vlgmr.msra.gmra.mxu0 %vm138_vm2, %v2567_v11 }
 0x14a   :  { %2251 = vmatprep.mubr.msk.f32.mxu0 %vm2464_vm1, %v2463_v6 }
 0x205   :  { %v209_v24 = vpop.f32.mrf.mxu0 }
 0x206   :  { %v290_v25 = vmul.f32 0.35355338, %v209_v24 }
 0x207   :  { %v2243_v26 = vpop.f32.mrf.mxu0 }
 0x208   :  { %v304_v27 = vadd.f32 %v2594_v22, %v290_v25  ;;  %v480_v26 = vld [vmem:[%s2844_s4] sm:$0xff] }
 0x209   :  { %v286_v29 = vpop.f32.mrf.mxu0 }
 0x20a   :  { %v291_v30 = vmul.f32 0.35355338, %v286_v29  ;;  %v306_v31 = vsel %vm138_vm2, %v304_v27, -inf }
 0x20b   :  { %307 = vmax.xlane.f32.xlu1 %v306_v31  ;;  %v2248_v32 = vpop.f32.mrf.mxu0 }
 0x20c   :  { %v305_v33 = vadd.f32 %v2598_v28, %v291_v30 }
 0x20e   :  { %v309_v34 = vsel %vm138_vm2, %v305_v33, -inf }
 0x20f   :  { %310 = vmax.xlane.f32.xlu1 %v309_v34 }
 0x220   :  { %328 = vrot.lane.b32.xlu1 %v2564_v10, %s2466_s1 }
 0x224   :  { %404 = vrot.lane.b32.xlu1 %v2567_v11, %s2466_s1 }
 0x228   :  { %483 = vrot.lane.b32.xlu1 %v2564_v10, %s2467_s25 }
 0x22c   :  { %561 = vrot.lane.b32.xlu1 %v2567_v11, %s2467_s25 }
 0x294   :  { %v308_v35 = vpop.xlane.xlu1 %307 }
 0x295   :  { %v312_v36 = vsub.f32 %v304_v27, %v308_v35 }
 0x297   :  { %v314_v37 = vmul.f32 1.442695, %v312_v36 }
 0x298   :  { %v311_v38 = vpop.xlane.xlu1 %310 }
 0x299   :  { %2401 = vpow2.f32 %v314_v37  ;;  %v313_v39 = vsub.f32 %v305_v33, %v311_v38  ;;  %v2128_v38 = vld [vmem:[%s2844_s4 + $0x8] sm:$0xff] }
 0x29b   :  { %v316_v40 = vmul.f32 1.442695, %v313_v39 }
 0x29c   :  { %v329_v41 = vpop.permute.xlu1 %328 }
 0x29d   :  { %2403 = vpow2.f32 %v316_v40  ;;  %2250 = vmatpush3.msra.mxu0 %v329_v41 }
 0x29e   :  { %2254 = vmatprep.subr.mxu0 %v2463_v6 }
 0x2a0   :  { %v405_v42 = vpop.permute.xlu1 %404 }
 0x2a4   :  { %v484_v43 = vpop.permute.xlu1 %483 }
 0x2a6   :  { %v2402_v44 = vpop.eup %2401 }
 0x2a7   :  { %v318_v45 = vsel %vm138_vm2, %v2402_v44, 0.0 }
 0x2a8   :  { %319 = vadd.xlane.f32.xlu0 %v318_v45  ;;  %v562_v46 = vpop.permute.xlu1 %561 }
 0x2a9   :  { %2265 = vmatpush3.xpose.msk.msra.mxu1 %vm138_vm2, %v562_v46 }
 0x2aa   :  { %v2404_v47 = vpop.eup %2403  ;;  %2274 = vmatprep.subr.mxu1 %v2463_v6 }
 0x2ab   :  { %v321_v48 = vsel %vm138_vm2, %v2404_v47, 0.0 }
 0x2ac   :  { %322 = vadd.xlane.f32.xlu1 %v321_v48 }
 0x2bd   :  { %559 = vrot.lane.b32.xlu1 %v2567_v11, %s2468_s26 }
 0x2be   :  { %481 = vrot.lane.b32.xlu0 %v2564_v10, %s2468_s26 }
 0x331   :  { %v320_v49 = vpop.xlane.xlu0 %319 }
 0x332   :  { %2405 = vrcp.f32 %v320_v49 }
 0x335   :  { %v323_v50 = vpop.xlane.xlu1 %322  ;;  %v482_v56 = vpop.permute.xlu0 %481 }
 0x336   :  { %2407 = vrcp.f32 %v323_v50 }
 0x339   :  { %v560_v51 = vpop.permute.xlu1 %559 }
 0x33a   :  { %2267 = vmatmul.mubr.msk.f32.vlgmr.msra.gmra.mxu1 %vm138_vm2, %v560_v51 }
 0x33b   :  { %2276 = vmatprep.mubr.msk.f32.mxu1 %vm2464_vm1, %v2463_v6 }
 0x33f   :  { %v2406_v52 = vpop.eup %2405 }
 0x340   :  { %v326_v53 = vmul.f32 %v2406_v52, %v2402_v44 }
 0x342   :  { %2252 = vmatmul.mubr.msk.f32.vlgmr.msra.gmra.mxu0 %vm138_vm2, %v326_v53 }
 0x343   :  { %v2408_v54 = vpop.eup %2407  ;;  %2255 = vmatpush3.msra.mxu0 %v405_v42  ;;  %2256 = vmatprep.mubr.msk.f32.mxu0 %vm2464_vm1, %v2463_v6 }
 0x344   :  { %2259 = vmatprep.subr.mxu0 %v2463_v6  ;;  %v327_v55 = vmul.f32 %v2408_v54, %v2404_v47 }
 0x346   :  { %2257 = vmatmul.mubr.msk.f32.vlgmr.msra.gmra.mxu0 %vm138_vm2, %v327_v55 }
 0x347   :  { %2260 = vmatpush3.xpose.msk.msra.mxu0 %vm138_vm2, %v484_v43  ;;  %2261 = vmatprep.mubr.msk.f32.mxu0 %vm2464_vm1, %v2463_v6 }
 0x348   :  { %2269 = vmatprep.subr.mxu0 %v2463_v6 }
 0x34a   :  { %2262 = vmatmul.mubr.msk.f32.vlgmr.msra.gmra.mxu0 %vm138_vm2, %v482_v56 }
 0x34b   :  { %2271 = vmatprep.mubr.msk.f32.mxu0 %vm2464_vm1, %v2463_v6 }
 0x3fa   :  { %v633_v57 = vpop.f32.mrf.mxu1 }
 0x3fb   :  { %v638_v58 = vmul.f32 0.35355338, %v633_v57 }
 0x3fc   :  { %v2268_v59 = vpop.f32.mrf.mxu1 }
 0x3fd   :  { %v640_v60 = vadd.f32 %v638_v58, %v2598_v28 }
 0x3ff   :  { %v644_v61 = vsel %vm138_vm2, %v640_v60, -inf }
 0x400   :  { %645 = vmax.xlane.f32.xlu0 %v644_v61 }
 0x402   :  { %v400_v62 = vpop.f32.mrf.mxu0 }
 0x404   :  { %v2253_v63 = vpop.f32.mrf.mxu0 }
 0x406   :  { %v476_v0 = vpop.f32.mrf.mxu0 }
 0x408   :  { %v2258_v1 = vpop.f32.mrf.mxu0 }
 0x40a   :  { %v555_v3 = vpop.f32.mrf.mxu0 }
 0x40b   :  { %v637_v4 = vmul.f32 0.35355338, %v555_v3 }
 0x40c   :  { %v2263_v7 = vpop.f32.mrf.mxu0 }
 0x40d   :  { %v639_v8 = vadd.f32 %v637_v4, %v2594_v22 }
 0x40f   :  { %v641_v9 = vsel %vm138_vm2, %v639_v8, -inf }
 0x410   :  { %642 = vmax.xlane.f32.xlu1 %v641_v9 }
 0x416   :  { %739 = vrot.lane.b32.xlu0 %v2567_v11, %s2469_s27 }
 0x41a   :  { %979 = vrot.lane.b32.xlu0 %v2564_v10, %s2470_s28 }
 0x489   :  { %v646_v12 = vpop.xlane.xlu0 %645 }
 0x48a   :  { %v648_v13 = vsub.f32 %v640_v60, %v646_v12 }
 0x48c   :  { %v651_v14 = vmul.f32 1.442695, %v648_v13 }
 0x48d   :  { %v740_v15 = vpop.permute.xlu0 %739 }
 0x48e   :  { %2409 = vpow2.f32 %v651_v14  ;;  %2275 = vmatpush3.msra.mxu1 %v740_v15 }
 0x48f   :  { %2284 = vmatprep.subr.mxu1 %v480_v26 }
 0x491   :  { %v980_v49 = vpop.permute.xlu0 %979 }
 0x499   :  { %v643_v16 = vpop.xlane.xlu1 %642 }
 0x49a   :  { %v647_v18 = vsub.f32 %v639_v8, %v643_v16 }
 0x49b   :  { %v2410_v19 = vpop.eup %2409 }
 0x49c   :  { %v649_v21 = vmul.f32 1.442695, %v647_v18  ;;  %v656_v23 = vsel %vm138_vm2, %v2410_v19, 0.0 }
 0x49d   :  { %657 = vadd.xlane.f32.xlu1 %v656_v23 }
 0x49e   :  { %2411 = vpow2.f32 %v649_v21  ;;  %v2139_v21 = vld [vmem:[%s2844_s4 + $0x10] sm:$0xff] }
 0x4ab   :  { %v2412_v24 = vpop.eup %2411 }
 0x4ac   :  { %v653_v25 = vsel %vm138_vm2, %v2412_v24, 0.0 }
 0x4ad   :  { %654 = vadd.xlane.f32.xlu1 %v653_v25 }
 0x4be   :  { %663 = vrot.lane.b32.xlu1 %v2564_v10, %s2469_s27 }
 0x4c2   :  { %981 = vrot.lane.b32.xlu1 %v2564_v10, %s2471_s10 }
 0x4c6   :  { %1059 = vrot.lane.b32.xlu1 %v2567_v11, %s2471_s10 }
 0x4ca   :  { %1057 = vrot.lane.b32.xlu1 %v2567_v11, %s2470_s28 }
 0x526   :  { %v658_v27 = vpop.xlane.xlu1 %657 }
 0x527   :  { %2413 = vrcp.f32 %v658_v27 }
 0x534   :  { %v2414_v29 = vpop.eup %2413 }
 0x535   :  { %v662_v30 = vmul.f32 %v2414_v29, %v2410_v19 }
 0x536   :  { %v655_v31 = vpop.xlane.xlu1 %654 }
 0x537   :  { %2415 = vrcp.f32 %v655_v31  ;;  %2277 = vmatmul.mubr.msk.f32.vlgmr.msra.gmra.mxu1 %vm138_vm2, %v662_v30 }
 0x538   :  { %2286 = vmatprep.mubr.msk.f32.mxu1 %vm138_vm2, %v400_v62  ;;  %2285 = vmatpush3.msra.mxu1 %v480_v26 }
 0x539   :  { %2294 = vmatprep.subr.mxu1 %v2463_v6 }
 0x53a   :  { %v664_v32 = vpop.permute.xlu1 %663 }
 0x53b   :  { %2270 = vmatpush3.msra.mxu0 %v664_v32  ;;  %2287 = vmatmul.mubr.msk.f32.vlgmr.msra.gmra.mxu1 %vm138_vm2, %v476_v0 }
 0x53c   :  { %2296 = vmatprep.mubr.msk.f32.mxu1 %vm2464_vm1, %v2463_v6  ;;  %2279 = vmatprep.subr.mxu0 %v2128_v38 }
 0x53e   :  { %v982_v33 = vpop.permute.xlu1 %981 }
 0x542   :  { %v1060_v34 = vpop.permute.xlu1 %1059 }
 0x543   :  { %2295 = vmatpush3.xpose.msk.msra.mxu1 %vm138_vm2, %v1060_v34 }
 0x544   :  { %v2416_v35 = vpop.eup %2415  ;;  %2304 = vmatprep.subr.mxu1 %v2463_v6 }
 0x545   :  { %v661_v36 = vmul.f32 %v2416_v35, %v2412_v24 }
 0x546   :  { %v1058_v37 = vpop.permute.xlu1 %1057 }
 0x547   :  { %2272 = vmatmul.mubr.msk.f32.vlgmr.msra.gmra.mxu0 %vm138_vm2, %v661_v36  ;;  %2297 = vmatmul.mubr.msk.f32.vlgmr.msra.gmra.mxu1 %vm138_vm2, %v1058_v37 }
 0x548   :  { %2306 = vmatprep.mubr.msk.f32.mxu1 %vm2464_vm1, %v2463_v6  ;;  %2280 = vmatpush3.msra.mxu0 %v2128_v38 }
 0x549   :  { %2289 = vmatprep.subr.mxu0 %v2463_v6 }
 0x5f7   :  { %v811_v39 = vpop.f32.mrf.mxu1 }
 0x5f9   :  { %v2278_v40 = vpop.f32.mrf.mxu1 }
 0x5fb   :  { %v2660_v41 = vpop.f32.mrf.mxu1 }
 0x5fd   :  { %v2662_v42 = vpop.f32.mrf.mxu1 }
 0x607   :  { %v735_v43 = vpop.f32.mrf.mxu0  ;;  %v1131_v44 = vpop.f32.mrf.mxu1 }
 0x608   :  { %v1136_v45 = vmul.f32 0.35355338, %v1131_v44  ;;  %2281 = vmatprep.mubr.msk.f32.mxu0 %vm138_vm2, %v735_v43 }
 0x609   :  { %v2273_v46 = vpop.f32.mrf.mxu0  ;;  %2282 = vmatmul.mubr.msk.f32.vlgmr.msra.gmra.mxu0 %vm138_vm2, %v811_v39  ;;  %v2298_v47 = vpop.f32.mrf.mxu1 }
 0x60a   :  { %2290 = vmatpush3.xpose.msk.msra.mxu0 %vm138_vm2, %v982_v33  ;;  %2291 = vmatprep.mubr.msk.f32.mxu0 %vm2464_vm1, %v2463_v6  ;;  %v1138_v48 = vadd.f32 %v1136_v45, %v2598_v28 }
 0x60b   :  { %2299 = vmatprep.subr.mxu0 %v2463_v6 }
 0x60c   :  { %v1142_v50 = vsel %vm138_vm2, %v1138_v48, -inf }
 0x60d   :  { %1143 = vmax.xlane.f32.xlu1 %v1142_v50  ;;  %2292 = vmatmul.mubr.msk.f32.vlgmr.msra.gmra.mxu0 %vm138_vm2, %v980_v49 }
 0x60e   :  { %2301 = vmatprep.mubr.msk.f32.mxu0 %vm2464_vm1, %v2463_v6 }
 0x61e   :  { %1161 = vrot.lane.b32.xlu1 %v2564_v10, %s2472_s13 }
 0x622   :  { %1400 = vrot.lane.b32.xlu1 %v2564_v10, %s2473_s14 }
 0x626   :  { %1478 = vrot.lane.b32.xlu1 %v2567_v11, %s2473_s14 }
 0x62a   :  { %1476 = vrot.lane.b32.xlu1 %v2567_v11, %s2474_s15 }
 0x696   :  { %v1144_v51 = vpop.xlane.xlu1 %1143 }
 0x697   :  { %v1146_v53 = vsub.f32 %v1138_v48, %v1144_v51 }
 0x699   :  { %v1149_v54 = vmul.f32 1.442695, %v1146_v53 }
 0x69a   :  { %v1162_v52 = vpop.permute.xlu1 %1161 }
 0x69b   :  { %2300 = vmatpush3.msra.mxu0 %v1162_v52  ;;  %2417 = vpow2.f32 %v1149_v54 }
 0x69c   :  { %2309 = vmatprep.subr.mxu0 %v2139_v21 }
 0x69e   :  { %v1401_v15 = vpop.permute.xlu1 %1400 }
 0x6a2   :  { %v1479_v31 = vpop.permute.xlu1 %1478 }
 0x6a6   :  { %v1477_v34 = vpop.permute.xlu1 %1476 }
 0x6a8   :  { %v2418_v62 = vpop.eup %2417 }
 0x6a9   :  { %v1154_v63 = vsel %vm138_vm2, %v2418_v62, 0.0 }
 0x6c9   :  { %v2680_v55 = vpop.f32.mrf.mxu0 }
 0x6ca   :  { %v976_v39 = vadd.f32 %v2660_v41, %v2680_v55 }
 0x6cb   :  { %v2682_v56 = vpop.f32.mrf.mxu0 }
 0x6cc   :  { %v971_v43 = vadd.f32 %v2662_v42, %v2682_v56 }
 0x6cd   :  { %v1053_v57 = vpop.f32.mrf.mxu0 }
 0x6ce   :  { %v1135_v58 = vmul.f32 0.35355338, %v1053_v57 }
 0x6cf   :  { %v2293_v59 = vpop.f32.mrf.mxu0 }
 0x6d0   :  { %v1137_v60 = vadd.f32 %v1135_v58, %v2594_v22 }
 0x6d2   :  { %v1139_v61 = vsel %vm138_vm2, %v1137_v60, -inf }
 0x6d3   :  { %1140 = vmax.xlane.f32.xlu0 %v1139_v61 }
 0x6d7   :  { %1155 = vadd.xlane.f32.xlu0 %v1154_v63 }
 0x75c   :  { %v1141_v0 = vpop.xlane.xlu0 %1140 }
 0x75d   :  { %v1145_v1 = vsub.f32 %v1137_v60, %v1141_v0  ;;  %v2736_v0 = vld [vmem:[%s2848_s8] sm:$0x3f] }
 0x75f   :  { %v1147_v3 = vmul.f32 1.442695, %v1145_v1  ;;  %v1820_v1 = vrot.slane %v2736_v0, %v2591_v20 }
 0x760   :  { %v1156_v8 = vpop.xlane.xlu0 %1155 }
 0x761   :  { %2419 = vpow2.f32 %v1147_v3 }
 0x762   :  { %2421 = vrcp.f32 %v1156_v8 }
 0x76e   :  { %v2420_v4 = vpop.eup %2419 }
 0x76f   :  { %v1151_v7 = vsel %vm138_vm2, %v2420_v4, 0.0  ;;  %v2422_v12 = vpop.eup %2421 }
 0x770   :  { %1152 = vadd.xlane.f32.xlu0 %v1151_v7  ;;  %v1160_v14 = vmul.f32 %v2422_v12, %v2418_v62 }
 0x786   :  { %1237 = vrot.lane.b32.xlu0 %v2567_v11, %s2472_s13 }
 0x78a   :  { %1398 = vrot.lane.b32.xlu0 %v2564_v10, %s2474_s15 }
 0x7f9   :  { %v1153_v9 = vpop.xlane.xlu0 %1152 }
 0x7fa   :  { %2423 = vrcp.f32 %v1153_v9 }
 0x7fd   :  { %v1238_v13 = vpop.permute.xlu0 %1237 }
 0x7fe   :  { %2305 = vmatpush3.msra.mxu1 %v1238_v13 }
 0x7ff   :  { %2307 = vmatmul.mubr.msk.f32.vlgmr.msra.gmra.mxu1 %vm138_vm2, %v1160_v14  ;;  %2314 = vmatprep.subr.mxu1 %v2463_v6 }
 0x800   :  { %2315 = vmatpush3.xpose.msk.msra.mxu1 %vm138_vm2, %v1401_v15  ;;  %2316 = vmatprep.mubr.msk.f32.mxu1 %vm2464_vm1, %v2463_v6 }
 0x801   :  { %v1399_v16 = vpop.permute.xlu0 %1398  ;;  %2324 = vmatprep.subr.mxu1 %v2463_v6 }
 0x803   :  { %2317 = vmatmul.mubr.msk.f32.vlgmr.msra.gmra.mxu1 %vm138_vm2, %v1399_v16 }
 0x804   :  { %2326 = vmatprep.mubr.msk.f32.mxu1 %vm2464_vm1, %v2463_v6 }
 0x807   :  { %v2424_v18 = vpop.eup %2423 }
 0x808   :  { %v1159_v19 = vmul.f32 %v2424_v18, %v2420_v4 }
 0x80a   :  { %2302 = vmatmul.mubr.msk.f32.vlgmr.msra.gmra.mxu0 %vm138_vm2, %v1159_v19 }
 0x80b   :  { %2310 = vmatpush3.msra.mxu0 %v2139_v21 }
 0x80c   :  { %2319 = vmatprep.subr.mxu0 %v2463_v6 }
 0x8bf   :  { %v1309_v23 = vpop.f32.mrf.mxu1 }
 0x8c1   :  { %v2308_v24 = vpop.f32.mrf.mxu1 }
 0x8c3   :  { %v1472_v25 = vpop.f32.mrf.mxu1 }
 0x8c4   :  { %v1554_v26 = vmul.f32 0.35355338, %v1472_v25 }
 0x8c5   :  { %v2318_v27 = vpop.f32.mrf.mxu1 }
 0x8c6   :  { %v1556_v29 = vadd.f32 %v1554_v26, %v2594_v22  ;;  %v1867_v27 = vld [vmem:[%s2845_s5 + $0x18] sm:$0xff] }
 0x8c8   :  { %v1558_v30 = vsel %vm138_vm2, %v1556_v29, -inf }
 0x8c9   :  { %1559 = vmax.xlane.f32.xlu0 %v1558_v30  ;;  %v1865_v30 = vld [vmem:[%s2845_s5 + $0x8] sm:$0xff] }
 0x8ca   :  { %v1233_v32 = vpop.f32.mrf.mxu0 }
 0x8cb   :  { %2311 = vmatprep.mubr.msk.f32.mxu0 %vm138_vm2, %v1233_v32  ;;  %v1973_v32 = vld [vmem:[%s2847_s7 + $0x78] sm:$0xff] }
 0x8cc   :  { %v2303_v33 = vpop.f32.mrf.mxu0  ;;  %2312 = vmatmul.mubr.msk.f32.vlgmr.msra.gmra.mxu0 %vm138_vm2, %v1309_v23 }
 0x8cd   :  { %2320 = vmatpush3.xpose.msk.msra.mxu0 %vm138_vm2, %v1479_v31  ;;  %2321 = vmatprep.mubr.msk.f32.mxu0 %vm2464_vm1, %v2463_v6  ;;  %v1864_v31 = vld [vmem:[%s2845_s5] sm:$0xff]  ;;  %v1972_v33 = vld [vmem:[%s2847_s7 + $0x70] sm:$0xff] }
 0x8ce   :  { %2329 = vmatprep.subr.mxu0 %v2463_v6 }
 0x8d0   :  { %2322 = vmatmul.mubr.msk.f32.vlgmr.msra.gmra.mxu0 %vm138_vm2, %v1477_v34  ;;  %v1971_v34 = vld [vmem:[%s2847_s7 + $0x68] sm:$0xff] }
 0x8d1   :  { %2331 = vmatprep.mubr.msk.f32.mxu0 %vm2464_vm1, %v2463_v6 }
 0x952   :  { %v1560_v22 = vpop.xlane.xlu0 %1559 }
 0x953   :  { %v1564_v35 = vsub.f32 %v1556_v29, %v1560_v22  ;;  %v1866_v29 = vld [vmem:[%s2845_s5 + $0x10] sm:$0xff]  ;;  %v1970_v22 = vld [vmem:[%s2847_s7 + $0x60] sm:$0xff] }
 0x955   :  { %v1566_v36 = vmul.f32 1.442695, %v1564_v35  ;;  %v1969_v35 = vld [vmem:[%s2847_s7 + $0x58] sm:$0xff] }
 0x957   :  { %2425 = vpow2.f32 %v1566_v36  ;;  %v1968_v36 = vld [vmem:[%s2847_s7 + $0x50] sm:$0xff] }
 0x964   :  { %v2426_v37 = vpop.eup %2425 }
 0x965   :  { %v1570_v38 = vsel %vm138_vm2, %v2426_v37, 0.0 }
 0x966   :  { %1571 = vadd.xlane.f32.xlu0 %v1570_v38  ;;  %v1966_v38 = vld [vmem:[%s2847_s7 + $0x40] sm:$0xff] }
 0x98c   :  { %v2313_v40 = vpop.f32.mrf.mxu0 }
 0x98d   :  { %v1397_v44 = vadd.f32 %v2313_v40, %v976_v39  ;;  %v1965_v39 = vld [vmem:[%s2847_s7 + $0x38] sm:$0xff]  ;;  %v1964_v40 = vld [vmem:[%s2847_s7 + $0x30] sm:$0xff] }
 0x98e   :  { %v1387_v45 = vpop.f32.mrf.mxu0 }
 0x98f   :  { %v1396_v46 = vadd.f32 %v1387_v45, %v971_v43  ;;  %v1963_v43 = vld [vmem:[%s2847_s7 + $0x28] sm:$0xff] }
 0x990   :  { %v1550_v47 = vpop.f32.mrf.mxu0 }
 0x991   :  { %v1555_v6 = vmul.f32 0.35355338, %v1550_v47 }
 0x992   :  { %v2323_v48 = vpop.f32.mrf.mxu0 }
 0x993   :  { %v1557_v49 = vadd.f32 %v1555_v6, %v2598_v28 }
 0x995   :  { %v1561_v50 = vsel %vm138_vm2, %v1557_v49, -inf }
 0x996   :  { %1562 = vmax.xlane.f32.xlu1 %v1561_v50  ;;  %v1854_v50 = vsub.s32 1, %v2585_v17 }
 0x9a7   :  { %1580 = vrot.lane.b32.xlu1 %v2564_v10, %s2475_s18  ;;  %v2148_v10 = vld [vmem:[%s2844_s4 + $0x18] sm:$0xff] }
 0x9ef   :  { %v1572_v51 = vpop.xlane.xlu0 %1571 }
 0x9f0   :  { %2427 = vrcp.f32 %v1572_v51 }
 0x9fd   :  { %v2428_v52 = vpop.eup %2427 }
 0x9fe   :  { %v1578_v55 = vmul.f32 %v2428_v52, %v2426_v37  ;;  %v1967_v37 = vld [vmem:[%s2847_s7 + $0x48] sm:$0xff]  ;;  %v1860_v52 = vsub.s32 2, %v2585_v17 }
 0xa1f   :  { %v1563_v41 = vpop.xlane.xlu1 %1562 }
 0xa20   :  { %v1565_v53 = vsub.f32 %v1557_v49, %v1563_v41  ;;  %v1855_v41 = vrot.slane %v2736_v0, %v1854_v50 }
 0xa22   :  { %v1568_v42 = vmul.f32 1.442695, %v1565_v53 }
 0xa23   :  { %v1581_v54 = vpop.permute.xlu1 %1580 }
 0xa24   :  { %2429 = vpow2.f32 %v1568_v42  ;;  %2325 = vmatpush3.msra.mxu1 %v1581_v54 }
 0xa25   :  { %2327 = vmatmul.mubr.msk.f32.vlgmr.msra.gmra.mxu1 %vm138_vm2, %v1578_v55  ;;  %2334 = vmatprep.subr.mxu1 %v2148_v10 }
 0xa26   :  { %2335 = vmatpush3.msra.mxu1 %v2148_v10 }
 0xa27   :  { %2350 = vmatprep.subr.mxu1 %v1973_v32 }
 0xa31   :  { %v2430_v56 = vpop.eup %2429 }
 0xa32   :  { %v1573_v28 = vsel %vm138_vm2, %v2430_v56, 0.0 }
 0xa33   :  { %1574 = vadd.xlane.f32.xlu0 %v1573_v28 }
 0xa49   :  { %1656 = vrot.lane.b32.xlu0 %v2567_v11, %s2475_s18 }
 0xabc   :  { %v1575_v57 = vpop.xlane.xlu0 %1574 }
 0xabd   :  { %2431 = vrcp.f32 %v1575_v57 }
 0xac0   :  { %v1657_v58 = vpop.permute.xlu0 %1656 }
 0xac1   :  { %2330 = vmatpush3.msra.mxu0 %v1657_v58  ;;  %v1961_v58 = vld [vmem:[%s2847_s7 + $0x18] sm:$0xff] }
 0xac2   :  { %2339 = vmatprep.subr.mxu0 %v1867_v27 }
 0xaca   :  { %v2432_v59 = vpop.eup %2431 }
 0xacb   :  { %v1579_v60 = vmul.f32 %v2432_v59, %v2430_v56  ;;  %v1861_v56 = vrot.slane %v2736_v0, %v1860_v52  ;;  %v1960_v59 = vld [vmem:[%s2847_s7 + $0x10] sm:$0xff] }
 0xacd   :  { %2332 = vmatmul.mubr.msk.f32.vlgmr.msra.gmra.mxu0 %vm138_vm2, %v1579_v60  ;;  %v1959_v60 = vld [vmem:[%s2847_s7 + $0x8] sm:$0xff] }
 0xace   :  { %2340 = vmatpush3.msra.mxu0 %v1867_v27 }
 0xacf   :  { %2341 = vmatprep.subr.mxu0 %v1866_v29 }
 0xad0   :  { %2342 = vmatpush3.msra.mxu0 %v1866_v29 }
 0xad1   :  { %2343 = vmatprep.subr.mxu0 %v1865_v30 }
 0xad2   :  { %2344 = vmatpush3.msra.mxu0 %v1865_v30 }
 0xad3   :  { %2345 = vmatprep.subr.mxu0 %v1864_v31 }
 0xad4   :  { %2346 = vmatpush3.msra.mxu0 %v1864_v31 }
 0xae5   :  { %v1652_v61 = vpop.f32.mrf.mxu1 }
 0xae6   :  { %2336 = vmatprep.mubr.msk.f32.mxu1 %vm138_vm2, %v1652_v61  ;;  %v1958_v61 = vld [vmem:[%s2847_s7] sm:$0xff] }
 0xae7   :  { %v2328_v62 = vpop.f32.mrf.mxu1 }
 0xae8   :  { %v2151_v62 = vld [vmem:[%s2846_s6] ss:$0 sm:$0xff]  ;;  %s2476_s6 = smov [#allocation2]  }
 0xb8d   :  { %v1728_v63 = vpop.f32.mrf.mxu0 }
 0xb8e   :  { %2337 = vmatmul.mubr.msk.f32.vlgmr.msra.gmra.mxu1 %vm138_vm2, %v1728_v63 }
 0xb8f   :  { %v2333_v11 = vpop.f32.mrf.mxu0  ;;  %2351 = vmatpush3.msra.mxu1 %v1973_v32 }
 0xb90   :  { %2352 = vmatprep.subr.mxu1 %v1972_v33 }
 0xb91   :  { %2353 = vmatpush3.msra.mxu1 %v1972_v33 }
 0xb92   :  { %2354 = vmatprep.subr.mxu1 %v1971_v34 }
 0xb93   :  { %2355 = vmatpush3.msra.mxu1 %v1971_v34 }
 0xb94   :  { %2356 = vmatprep.subr.mxu1 %v1970_v22 }
 0xb95   :  { %2357 = vmatpush3.msra.mxu1 %v1970_v22 }
 0xb96   :  { %2358 = vmatprep.subr.mxu1 %v1969_v35 }
 0xb97   :  { %2359 = vmatpush3.msra.mxu1 %v1969_v35 }
 0xb98   :  { %2360 = vmatprep.subr.mxu1 %v1968_v36 }
 0xb99   :  { %2361 = vmatpush3.msra.mxu1 %v1968_v36  ;;  %v2083_v36 = vsub.s32 4, %v2585_v17 }
 0xb9a   :  { %2362 = vmatprep.subr.mxu1 %v1967_v37 }
 0xb9b   :  { %2363 = vmatpush3.msra.mxu1 %v1967_v37  ;;  %v2089_v37 = vsub.s32 5, %v2585_v17 }
 0xb9c   :  { %2364 = vmatprep.subr.mxu1 %v1966_v38 }
 0xb9d   :  { %2365 = vmatpush3.msra.mxu1 %v1966_v38  ;;  %v2084_v38 = vrot.slane %v2736_v0, %v2083_v36 }
 0xb9e   :  { %2366 = vmatprep.subr.mxu1 %v1965_v39 }
 0xb9f   :  { %2367 = vmatpush3.msra.mxu1 %v1965_v39 }
 0xba0   :  { %2368 = vmatprep.subr.mxu1 %v1964_v40 }
 0xba1   :  { %2369 = vmatpush3.msra.mxu1 %v1964_v40 }
 0xba2   :  { %2370 = vmatprep.subr.mxu1 %v1963_v43 }
 0xba3   :  { %2371 = vmatpush3.msra.mxu1 %v1963_v43  ;;  %v2090_v43 = vrot.slane %v2736_v0, %v2089_v37 }
 0xc4e   :  { %v2338_v3 = vpop.f32.mrf.mxu1 }
 0xc4f   :  { %v1816_v4 = vadd.f32 %v2338_v3, %v1397_v44  ;;  %v1962_v44 = vld [vmem:[%s2847_s7 + $0x20] sm:$0xff]  ;;  %s2100_s7 = sshll.u32 %s2476_s6, 4  ;;  %s2101_s7 = int_to_ptr.vmem [resolvable:$true] %s2100_s7 }
 0xc50   :  { %v1806_v7 = vpop.f32.mrf.mxu1  ;;  %2372 = vmatprep.subr.mxu1 %v1962_v44  ;;  %s2441_s5 = scalar_lea.vmem %s2101_s7, 256  ;;  %p2446_p1 = scmp.lt.s32.totalorder %s2101_s7, %s2101_s7 }
 0xc51   :  { %v1822_v8 = vadd.f32 %v1820_v1, %v1816_v4  ;;  %v1815_v9 = vadd.f32 %v1806_v7, %v1396_v46  ;;  %2373 = vmatpush3.msra.mxu1 %v1962_v44  ;;  %p2442_p0 = scmp.ne.s32.totalorder %s2101_s7, %s2441_s5  ;;  %p2447_p2 = scmp.lt.s32.totalorder %s2441_s5, %s2441_s5 }
 0xc52   :  { %2374 = vmatprep.subr.mxu1 %v1961_v58 }
 0xc53   :  { %v1821_v12 = vadd.f32 %v1820_v1, %v1815_v9  ;;  %v1824_v13 = vadd.f32 %v1822_v8, %v2551_v5  ;;  %2375 = vmatpush3.msra.mxu1 %v1961_v58  ;;  %v1976_v8 = vsub.s32 3, %v2585_v17  ;;  %p2448_p3 = por %p2447_p2, %p2446_p1 }
 0xc54   :  { %2376 = vmatprep.subr.mxu1 %v1960_v59 }
 0xc55   :  { %v1828_v14 = vsel %vm53_vm0, %v1824_v13, 0.0  ;;  %v1823_v15 = vadd.f32 %v1821_v12, %v2538_v2  ;;  %2377 = vmatpush3.msra.mxu1 %v1960_v59  ;;  %v1977_v9 = vrot.slane %v2736_v0, %v1976_v8  ;;  %p2449_p4 = pnand %p2448_p3, %p2442_p0 }
 0xc56   :  { %1829 = vadd.xlane.f32.xlu0 %v1828_v14  ;;  %2378 = vmatprep.subr.mxu1 %v1959_v60 }
 0xc57   :  { %v1825_v16 = vsel %vm53_vm0, %v1823_v15, 0.0  ;;  %2379 = vmatpush3.msra.mxu1 %v1959_v60 }
 0xc58   :  { %1826 = vadd.xlane.f32.xlu1 %v1825_v16  ;;  %2380 = vmatprep.subr.mxu1 %v1958_v61 }
 0xc59   :  { %2381 = vmatpush3.msra.mxu1 %v1958_v61 }
 0xcdf   :  { %v1830_v18 = vpop.xlane.xlu0 %1829 }
 0xce0   :  { %v1833_v19 = vmul.f32 0.03125, %v1830_v18 }
 0xce1   :  { %v1827_v21 = vpop.xlane.xlu1 %1826 }
 0xce2   :  { %v2744_v20 = vsub.f32 %v1824_v13, %v1833_v19  ;;  %v1832_v23 = vmul.f32 0.03125, %v1827_v21 }
 0xce4   :  { %v2746_v24 = vsub.f32 %v1823_v15, %v1832_v23  ;;  %v1837_v25 = vmul.f32 %v2744_v20, %v2744_v20 }
 0xce6   :  { %v1841_v5 = vsel %vm53_vm0, %v1837_v25, 0.0  ;;  %v1836_v2 = vmul.f32 %v2746_v24, %v2746_v24 }
 0xce7   :  { %1842 = vadd.xlane.f32.xlu0 %v1841_v5 }
 0xce8   :  { %v1838_v26 = vsel %vm53_vm0, %v1836_v2, 0.0 }
 0xce9   :  { %1839 = vadd.xlane.f32.xlu1 %v1838_v26 }
 0xd70   :  { %v1843_v45 = vpop.xlane.xlu0 %1842 }
 0xd71   :  { %v1845_v46 = vmul.f32 0.03125, %v1843_v45 }
 0xd72   :  { %v1840_v47 = vpop.xlane.xlu1 %1839 }
 0xd73   :  { %v1847_v6 = vadd.f32 1e-05, %v1845_v46  ;;  %v1844_v48 = vmul.f32 0.03125, %v1840_v47 }
 0xd75   :  { %2433 = vrsqrt.f32 %v1847_v6  ;;  %v1846_v49 = vadd.f32 1e-05, %v1844_v48 }
 0xd77   :  { %2435 = vrsqrt.f32 %v1846_v49 }
 0xd82   :  { %v2434_v51 = vpop.eup %2433 }
 0xd83   :  { %v1851_v53 = vmul.f32 %v2434_v51, %v2744_v20 }
 0xd84   :  { %v2436_v42 = vpop.eup %2435 }
 0xd85   :  { %v1850_v54 = vmul.f32 %v2436_v42, %v2746_v24  ;;  %v1857_v55 = vmul.f32 %v1855_v41, %v1851_v53 }
 0xd87   :  { %v1856_v28 = vmul.f32 %v1855_v41, %v1850_v54  ;;  %v1863_v57 = vadd.f32 %v1861_v56, %v1857_v55 }
 0xd89   :  { %v1862_v10 = vadd.f32 %v1861_v56, %v1856_v28 }
 0xd8b   :  { %2347 = vmatprep.mubr.msk.f32.mxu0 %vm53_vm0, %v1862_v10 }
 0xd8c   :  { %2348 = vmatmul.mubr.msk.f32.vlgmr.msra.gmra.mxu0 %vm53_vm0, %v1863_v57 }
 0xe4c   :  { %v2349_v63 = vpop.f32.mrf.mxu0 }
 0xe4d   :  { %v1953_v11 = vadd.f32 %v2349_v63, %v2151_v62 }
 0xe4e   :  { %v1947_v1 = vpop.f32.mrf.mxu0 }
 0xe4f   :  { %v1948_v3 = vadd.f32 %v2151_v62, %v1947_v1  ;;  %v1957_v7 = vmax.f32 %v1953_v11, 0.0 }
 0xe51   :  { %v1956_v4 = vmax.f32 %v1948_v3, 0.0 }
 0xe53   :  { %2382 = vmatprep.mubr.f32.mxu1 %v1956_v4 }
 0xe54   :  { %2383 = vmatmul.mubr.f32.vlgmr.msra.gmra.mxu1 %v1957_v7 }
 0xf14   :  { %v2384_v12 = vpop.f32.mrf.mxu1 }
 0xf15   :  { %v2050_v13 = vadd.f32 %v2384_v12, %v1977_v9 }
 0xf16   :  { %v2044_v14 = vpop.f32.mrf.mxu1 }
 0xf17   :  { %v2045_v15 = vadd.f32 %v2044_v14, %v1977_v9  ;;  %v2054_v16 = vadd.f32 %v2050_v13, %v1863_v57 }
 0xf19   :  { %v2058_v18 = vsel %vm53_vm0, %v2054_v16, 0.0  ;;  %v2053_v19 = vadd.f32 %v2045_v15, %v1862_v10 }
 0xf1a   :  { %2059 = vadd.xlane.f32.xlu0 %v2058_v18 }
 0xf1b   :  { %v2055_v21 = vsel %vm53_vm0, %v2053_v19, 0.0 }
 0xf1c   :  { %2056 = vadd.xlane.f32.xlu1 %v2055_v21 }
 0xfa3   :  { %v2060_v20 = vpop.xlane.xlu0 %2059 }
 0xfa4   :  { %v2062_v23 = vmul.f32 0.03125, %v2060_v20 }
 0xfa5   :  { %v2057_v24 = vpop.xlane.xlu1 %2056 }
 0xfa6   :  { %v2064_v25 = vsub.f32 %v2054_v16, %v2062_v23  ;;  %v2061_v5 = vmul.f32 0.03125, %v2057_v24 }
 0xfa8   :  { %v2063_v2 = vsub.f32 %v2053_v19, %v2061_v5  ;;  %v2066_v26 = vmul.f32 %v2064_v25, %v2064_v25 }
 0xfaa   :  { %v2070_v27 = vsel %vm53_vm0, %v2066_v26, 0.0  ;;  %v2065_v29 = vmul.f32 %v2063_v2, %v2063_v2 }
 0xfab   :  { %2071 = vadd.xlane.f32.xlu0 %v2070_v27 }
 0xfac   :  { %v2067_v30 = vsel %vm53_vm0, %v2065_v29, 0.0 }
 0xfad   :  { %2068 = vadd.xlane.f32.xlu1 %v2067_v30 }
0x1034   :  { %v2072_v31 = vpop.xlane.xlu0 %2071 }
0x1035   :  { %v2074_v32 = vmul.f32 0.03125, %v2072_v31 }
0x1036   :  { %v2069_v33 = vpop.xlane.xlu1 %2068 }
0x1037   :  { %v2076_v34 = vadd.f32 1e-05, %v2074_v32  ;;  %v2073_v22 = vmul.f32 0.03125, %v2069_v33 }
0x1039   :  { %2437 = vrsqrt.f32 %v2076_v34  ;;  %v2075_v35 = vadd.f32 1e-05, %v2073_v22 }
0x103b   :  { %2439 = vrsqrt.f32 %v2075_v35 }
0x1046   :  { %v2438_v39 = vpop.eup %2437 }
0x1047   :  { %v2080_v40 = vmul.f32 %v2438_v39, %v2064_v25 }
0x1048   :  { %v2440_v44 = vpop.eup %2439 }
0x1049   :  { %v2079_v45 = vmul.f32 %v2440_v44, %v2063_v2  ;;  %v2086_v46 = vmul.f32 %v2084_v38, %v2080_v40 }
0x104b   :  { %v2085_v47 = vmul.f32 %v2084_v38, %v2079_v45  ;;  %v2092_v6 = vadd.f32 %v2090_v43, %v2086_v46 }
0x104d   :  { %v2091_v48 = vadd.f32 %v2090_v43, %v2085_v47  ;;  %2094 = vst.msk [vmem:[#allocation2 + $0x8] sm:$0xff] %vm53_vm0, %v2092_v6 }
0x104f   :  { %2093 = vst.msk [vmem:[#allocation2] sm:$0xff] %vm53_vm0, %v2091_v48 }
0x1050   :  { %2452 = shalt.err (!%p2449_p4)
}
0x1051   :  { %s2477_s10 = smov 128   ;;  %s2478_s11 = smov 8  }
0x1052   :  { %2106 = dma.vmem_to_hbm [thread:$0]  %s2101_s7, 256, %s2849_s9, [#allocation3], %s2477_s10, %s2477_s10, %s2478_s11  }
0x1053   :  { %2461 = dma.done.wait [#allocation3], 256  }
0x1054   :  { %2462 = vsyncadd [#allocation3], 4294967040 }
0x1055   :  { %2110 = vsyncpa [#allocation3], 1 }

</bundles_post_ra>
